<compile_context>
chip_gen: v7x
topology: tpu7x:2x2x1
jax: 0.10.0
libtpu: 0.0.40
codegen_flags: <defaults>
</compile_context>

<pallas_src>
import functools

import jax
import jax.numpy as jnp
from jax.experimental import pallas as pl
from jax.experimental.pallas import tpu as pltpu


def _round_up(x, m):
    return ((x + m - 1) // m) * m


def _focal_loss_kernel(x_ref, t_ref, o_ref, *, gamma, alpha):
    x = x_ref[...].astype(jnp.float32)
    t = t_ref[...].astype(jnp.float32)
    # Numerically-stable BCE-with-logits (matches torch's formulation):
    #   bce = max(x, 0) - x*t + log(1 + exp(-|x|))
    bce = jnp.maximum(x, 0.0) - x * t + jnp.log1p(jnp.exp(-jnp.abs(x)))
    pt = jnp.exp(bce)
    # gamma is a static python int (default 2) -> exact integer power, safe
    # for the (1 - pt) <= 0 base this loss produces.
    modulator = (1.0 - pt) ** gamma
    o_ref[...] = (alpha * modulator * bce).astype(o_ref.dtype)


def focal_loss_ref(x, target, gamma=2, alpha=0.25):
    # Pure-JAX reference (also the fused tiny-input fast path).
    x = x.astype(jnp.float32)
    target = target.astype(jnp.float32)
    bce = jnp.maximum(x, 0.0) - x * target + jnp.log1p(jnp.exp(-jnp.abs(x)))
    pt = jnp.exp(bce)
    return alpha * (1.0 - pt) ** gamma * bce


def focal_loss(x, target, *, gamma=2, alpha=0.25,
               target_block_bytes=4 * 1024 * 1024,
               min_pallas_elements=262_144):
    """Elementwise focal loss; accepts any shape, returns same shape/dtype."""
    assert x.shape == target.shape
    orig_shape = x.shape
    out_dtype = x.dtype
    n = x.size

    # gamma must be static; integer-valued gamma uses an exact integer power.
    # TODO(synk): non-integer gamma with pt > 1 yields NaN (same as torch.pow
    # with a negative base) -- documented rather than silently changed.
    g = float(gamma)
    gamma_static = int(g) if g.is_integer() else g

    if n < min_pallas_elements:
        # Tiny inputs: one fused XLA elementwise op beats pad/dispatch/slice.
        return focal_loss_ref(x, target, gamma_static, alpha).astype(out_dtype)

    itemsize = jnp.dtype(out_dtype).itemsize
    sublane = {1: 32, 2: 16, 4: 8}.get(itemsize, 8)

    # Lane width: widest of (512, 256, 128) dividing n -> no padding at all;
    # otherwise 128 lanes with minimal (< 128 element) zero padding.
    lanes = 128
    for cand in (512, 256, 128):
        if n % cand == 0:
            lanes = cand
            break
    rows = pl.cdiv(n, lanes)
    pad = rows * lanes - n

    xf = x.reshape(-1)
    tf = target.reshape(-1)
    if pad:
        xf = jnp.pad(xf, (0, pad))
        tf = jnp.pad(tf, (0, pad))
    xf = xf.reshape(rows, lanes)
    tf = tf.reshape(rows, lanes)

    # Block rows: ~target_block_bytes per array, multiple of the dtype's
    # sublane packing; capped at ceil(rows/2) so the "parallel" grid has at
    # least 2 steps whenever possible (both v7x TensorCores busy).
    max_block_rows = (target_block_bytes // (itemsize * lanes)) // sublane * sublane
    max_block_rows = max(max_block_rows, sublane)
    if rows >= 2 * sublane:
        max_block_rows = min(max_block_rows, _round_up(pl.cdiv(rows, 2), sublane))
    block_rows = min(max_block_rows, rows)   # == rows (full dim) for small inputs
    grid = (pl.cdiv(rows, block_rows),)      # ragged last block is masked by Pallas

    kernel = functools.partial(_focal_loss_kernel, gamma=gamma_static, alpha=alpha)

    compiler_params = pltpu.CompilerParams(
        dimension_semantics=("parallel",),
        vmem_limit_bytes=48 * 1024 * 1024,
        # When padding was unavoidable, let XLA fuse the pad/reshape producers
        # into the kernel's input DMA instead of materializing padded copies.
        allow_input_fusion=[True, True] if pad else None,
    )

    out = pl.pallas_call(
        kernel,
        out_shape=jax.ShapeDtypeStruct((rows, lanes), out_dtype),
        grid=grid,
        in_specs=[
            pl.BlockSpec((block_rows, lanes), lambda i: (i, 0)),
            pl.BlockSpec((block_rows, lanes), lambda i: (i, 0)),
        ],
        out_specs=pl.BlockSpec((block_rows, lanes), lambda i: (i, 0)),
        compiler_params=compiler_params,
    )(xf, tf)

    if pad:
        return out.reshape(-1)[:n].reshape(orig_shape)
    return out.reshape(orig_shape)


if __name__ == "__main__":
    key = jax.random.PRNGKey(0)
    ks = jax.random.split(key, 8)

    def check(logits, targets, **kw):
        out = jax.block_until_ready(focal_loss(logits, targets, **kw))
        ref = focal_loss_ref(logits, targets)
        assert out.shape == logits.shape
        assert out.dtype == logits.dtype
        tol = 2e-2 if logits.dtype == jnp.bfloat16 else 1e-5
        assert jnp.allclose(out.astype(jnp.float32), ref, atol=tol, rtol=tol), \
            "mismatch vs reference"

    # (batch, num_labels) as in the DDI fine-tune usage. min_pallas_elements=0
    # forces the Pallas path for these small demo shapes (the default would
    # take the fused pure-XLA tiny-input fast path).
    B, D = 8, 256
    logits = jax.random.normal(ks[0], (B, D), dtype=jnp.float32)
    targets = (jax.random.uniform(ks[1], (B, D)) > 0.5).astype(jnp.float32)
    check(logits, targets, min_pallas_elements=0)

    # Ragged shape: exercises the minimal-pad fallback + input-fusion path.
    logits2 = jax.random.normal(ks[2], (7, 130), dtype=jnp.float32)
    targets2 = (jax.random.uniform(ks[3], (7, 130)) > 0.5).astype(jnp.float32)
    check(logits2, targets2, min_pallas_elements=0)

    # Multi-step grid (>= 2 "parallel" steps -> both v7x cores), zero padding.
    logits3 = jax.random.normal(ks[4], (64, 512), dtype=jnp.float32)
    targets3 = (jax.random.uniform(ks[5], (64, 512)) > 0.5).astype(jnp.float32)
    check(logits3, targets3, min_pallas_elements=0)

    # bf16 on the wire (16-sublane packing path, f32 compute inside the kernel).
    logits4 = jax.random.normal(ks[6], (48, 512), dtype=jnp.bfloat16)
    targets4 = (jax.random.uniform(ks[7], (48, 512)) > 0.5).astype(jnp.bfloat16)
    check(logits4, targets4, min_pallas_elements=0)

    # Default path for the true DDI shape: tiny-input fused-XLA fast path.
    check(logits, targets)

    print("KERNEL_OK")
</pallas_src>

<mosaic_0001>
module attributes {stable_mosaic.version = 11 : i64} {
  func.func @_focal_loss_kernel(%arg0: i32, %arg1: memref<4x512xf32, #tpu.memory_space<vmem>>, %arg2: memref<4x512xf32, #tpu.memory_space<vmem>>, %arg3: memref<4x512xf32, #tpu.memory_space<vmem>>) attributes {dimension_semantics = [#tpu.dimension_semantics<parallel>], iteration_bounds = array<i64: 1>, scalar_prefetch = 0 : i64, scratch_operands = 0 : i64, tpu.core_type = #tpu.core_type<tc>, window_params = [{transform_indices = @transform_0, window_bounds = array<i64: 4, 512>}, {transform_indices = @transform_1, window_bounds = array<i64: 4, 512>}, {transform_indices = @transform_2, window_bounds = array<i64: 4, 512>}]} {
    %c0 = arith.constant 0 : index
    %c0_0 = arith.constant 0 : index
    %0 = vector.load %arg1[%c0, %c0_0] : memref<4x512xf32, #tpu.memory_space<vmem>>, vector<4x512xf32>
    %c0_1 = arith.constant 0 : index
    %c0_2 = arith.constant 0 : index
    %1 = vector.load %arg2[%c0_1, %c0_2] : memref<4x512xf32, #tpu.memory_space<vmem>>, vector<4x512xf32>
    %cst = arith.constant 0.000000e+00 : f32
    %2 = vector.broadcast %cst : f32 to vector<4x512xf32>
    %3 = arith.maximumf %0, %2 : vector<4x512xf32>
    %4 = arith.mulf %0, %1 : vector<4x512xf32>
    %5 = arith.subf %3, %4 : vector<4x512xf32>
    %6 = math.absf %0 : vector<4x512xf32>
    %cst_3 = arith.constant 0.000000e+00 : f32
    %7 = vector.broadcast %cst_3 : f32 to vector<4x512xf32>
    %8 = arith.subf %7, %6 : vector<4x512xf32>
    %9 = math.exp %8 : vector<4x512xf32>
    %10 = math.log1p %9 : vector<4x512xf32>
    %11 = arith.addf %5, %10 : vector<4x512xf32>
    %12 = math.exp %11 : vector<4x512xf32>
    %cst_4 = arith.constant 1.000000e+00 : f32
    %13 = vector.broadcast %cst_4 : f32 to vector<4x512xf32>
    %14 = arith.subf %13, %12 : vector<4x512xf32>
    %15 = arith.mulf %14, %14 : vector<4x512xf32>
    %cst_5 = arith.constant 2.500000e-01 : f32
    %16 = vector.broadcast %cst_5 : f32 to vector<4x512xf32>
    %17 = arith.mulf %16, %15 : vector<4x512xf32>
    %18 = arith.mulf %17, %11 : vector<4x512xf32>
    %c0_6 = arith.constant 0 : index
    %c0_7 = arith.constant 0 : index
    %19 = vector.load %arg3[%c0_6, %c0_7] : memref<4x512xf32, #tpu.memory_space<vmem>>, vector<4x512xf32>
    tpu.vector_store %arg3[%c0_6, %c0_7], %18 {strides = array<i32>} : memref<4x512xf32, #tpu.memory_space<vmem>>, vector<4x512xf32>,
    return
  }
  func.func @transform_0(%arg0: i32) -> (i32, i32) {
    %c0_i32 = arith.constant 0 : i32
    %c0_i32_0 = arith.constant 0 : i32
    return %arg0, %c0_i32 : i32, i32
  }
  func.func @transform_1(%arg0: i32) -> (i32, i32) {
    %c0_i32 = arith.constant 0 : i32
    %c0_i32_0 = arith.constant 0 : i32
    return %arg0, %c0_i32 : i32, i32
  }
  func.func @transform_2(%arg0: i32) -> (i32, i32) {
    %c0_i32 = arith.constant 0 : i32
    %c0_i32_0 = arith.constant 0 : i32
    return %arg0, %c0_i32 : i32, i32
  }
}

</mosaic_0001>

<bundles_post_ra>
// kernel: tpu_custom_call.1
= control target key start
LH: loop header
LB: loop body
LE: loop exit
PB: predicated region body
PF: predicated region fallthrough
CT: control target
= control target key end

     0   :  { %7 = vsyncpa [#allocation3], 0  ;;  %s245_s0 = inlined_call_operand.hbm [shape: f32[4,512], index: 0, kind: input, shape index: {}]   ;;  %s246_s1 = inlined_call_operand.hbm [shape: f32[4,512], index: 1, kind: input, shape index: {}]   ;;  %s247_s2 = inlined_call_operand.hbm [shape: f32[4,512], index: 2, kind: output, shape index: {}]  }
   0x1   :  { %8 = vsyncpa [#allocation6], 0 }
   0x2   :  { %9 = vsyncpa [#allocation4], 0  ;;  %s191_s9 = smov [#allocation2]   ;;  %s192_s11 = smov [#allocation5]  }
   0x3   :  { %s16_s10 = sshll.u32 %s191_s9, 4  ;;  %s26_s12 = sshll.u32 %s192_s11, 4  ;;  %s17_s10 = int_to_ptr.vmem [resolvable:$true] %s16_s10  ;;  %s27_s12 = int_to_ptr.vmem [resolvable:$true] %s26_s12 }
   0x4   :  { %s119_s15 = scalar_lea.hbm %s245_s0, 256 }
   0x5   :  { %p120_p0 = scmp.ne.s32.totalorder %s245_s0, %s119_s15  ;;  %p123_p1 = scmp.lt.u32.totalorder %s119_s15, %s245_s0 }
   0x7   :  { %p125_p2 = pnand %p123_p1, %p120_p0 }
   0x9   :  { %128 = shalt.err (!%p125_p2)
}
   0xa   :  { %s129_s20 = scalar_lea.vmem %s17_s10, 256  ;;  %p134_p4 = scmp.lt.s32.totalorder %s17_s10, %s17_s10 }
   0xb   :  { %p130_p3 = scmp.ne.s32.totalorder %s17_s10, %s129_s20  ;;  %p135_p5 = scmp.lt.s32.totalorder %s129_s20, %s129_s20 }
   0xd   :  { %p136_p6 = por %p135_p5, %p134_p4 }
   0xf   :  { %p137_p7 = pnand %p136_p6, %p130_p3 }
  0x11   :  { %140 = shalt.err (!%p137_p7)
}
  0x12   :  { %19 = dma.hbm_to_vmem [thread:$0]  %s245_s0, 256, %s17_s10, [#allocation3]  }
  0x13   :  { %s141_s25 = scalar_lea.hbm %s246_s1, 256 }
  0x14   :  { %p142_p8 = scmp.ne.s32.totalorder %s246_s1, %s141_s25  ;;  %p145_p9 = scmp.lt.u32.totalorder %s141_s25, %s246_s1 }
  0x16   :  { %p147_p10 = pnand %p145_p9, %p142_p8 }
  0x18   :  { %150 = shalt.err (!%p147_p10)
}
  0x19   :  { %s151_s30 = scalar_lea.vmem %s27_s12, 256  ;;  %p156_p12 = scmp.lt.s32.totalorder %s27_s12, %s27_s12 }
  0x1a   :  { %p152_p11 = scmp.ne.s32.totalorder %s27_s12, %s151_s30  ;;  %p157_p13 = scmp.lt.s32.totalorder %s151_s30, %s151_s30 }
  0x1c   :  { %p158_p0 = por %p157_p13, %p156_p12 }
  0x1e   :  { %p159_p1 = pnand %p158_p0, %p152_p11 }
  0x20   :  { %162 = shalt.err (!%p159_p1)
}
  0x21   :  { %29 = dma.hbm_to_vmem [thread:$0]  %s246_s1, 256, %s27_s12, [#allocation6]  }
  0x22   :  { %185 = dma.done.wait [#allocation3], 256  }
  0x23   :  { %186 = vsyncadd [#allocation3], 4294967040 }
  0x24   :  { %187 = dma.done.wait [#allocation6], 256  }
  0x25   :  { %188 = vsyncadd [#allocation6], 4294967040  ;;  %v36_v0 = vld [vmem:[#allocation2] sm:$0xff]  ;;  %v37_v1 = vld [vmem:[#allocation2 + $0x8] sm:$0xff]  ;;  %s193_s1 = smov [#allocation7]  }
  0x26   :  { %v46_v2 = vand.u32 2147483647, %v36_v0  ;;  %v47_v3 = vand.u32 2147483647, %v37_v1  ;;  %v38_v14 = vld [vmem:[#allocation5] sm:$0xff]  ;;  %v39_v15 = vld [vmem:[#allocation5 + $0x8] sm:$0xff] }
  0x27   :  { %v40_v17 = vmax.f32 %v36_v0, 0.0  ;;  %v42_v18 = vmul.f32 %v38_v14, %v36_v0  ;;  %v41_v21 = vmax.f32 %v37_v1, 0.0  ;;  %v43_v22 = vmul.f32 %v39_v15, %v37_v1  ;;  %s94_s4 = sshll.u32 %s193_s1, 4  ;;  %s95_s4 = int_to_ptr.vmem [resolvable:$true] %s94_s4 }
  0x28   :  { %v48_v4 = vsub.f32 0.0, %v46_v2  ;;  %v49_v5 = vsub.f32 0.0, %v47_v3  ;;  %s163_s5 = scalar_lea.vmem %s95_s4, 256  ;;  %p168_p3 = scmp.lt.s32.totalorder %s95_s4, %s95_s4 }
  0x29   :  { %v44_v26 = vsub.f32 %v40_v17, %v42_v18  ;;  %v45_v30 = vsub.f32 %v41_v21, %v43_v22  ;;  %p164_p2 = scmp.ne.s32.totalorder %s95_s4, %s163_s5  ;;  %p169_p4 = scmp.lt.s32.totalorder %s163_s5, %s163_s5 }
  0x2a   :  { %v50_v6 = vmul.f32 1.442695, %v48_v4  ;;  %v52_v7 = vmul.f32 1.442695, %v49_v5 }
  0x2b   :  { %p170_p5 = por %p169_p4, %p168_p3 }
  0x2c   :  { %107 = vpow2.f32 %v50_v6 }
  0x2d   :  { %109 = vpow2.f32 %v52_v7  ;;  %p171_p6 = pnand %p170_p5, %p164_p2 }
  0x36   :  { %v108_v8 = vpop.eup %107 }
  0x37   :  { %v110_v9 = vpop.eup %109  ;;  %v54_v10 = vadd.f32 1.0, %v108_v8  ;;  %v57_v12 = vmul.f32 -0.5, %v108_v8  ;;  %v60_v19 = vand.u32 2147483647, %v108_v8 }
  0x38   :  { %v63_v11 = vadd.f32 1.0, %v110_v9  ;;  %v66_v13 = vmul.f32 -0.5, %v110_v9  ;;  %v69_v23 = vand.u32 2147483647, %v110_v9 }
  0x39   :  { %111 = vlog2.f32 %v54_v10  ;;  %v58_v16 = vadd.f32 1.0, %v57_v12  ;;  %vm61_vm0 = vcmp.lt.f32.partialorder %v60_v19, 0.0004427343 }
  0x3a   :  { %113 = vlog2.f32 %v63_v11  ;;  %v67_v20 = vadd.f32 1.0, %v66_v13  ;;  %vm70_vm1 = vcmp.lt.f32.partialorder %v69_v23, 0.0004427343 }
  0x3b   :  { %v59_v24 = vmul.f32 %v108_v8, %v58_v16 }
  0x3c   :  { %v68_v27 = vmul.f32 %v110_v9, %v67_v20 }
  0x43   :  { %v112_v25 = vpop.eup %111 }
  0x44   :  { %v114_v28 = vpop.eup %113  ;;  %v56_v29 = vmul.f32 0.6931472, %v112_v25 }
  0x45   :  { %v65_v31 = vmul.f32 0.6931472, %v114_v28 }
  0x46   :  { %v62_v32 = vsel %vm61_vm0, %v59_v24, %v56_v29 }
  0x47   :  { %v72_v33 = vadd.f32 %v62_v32, %v44_v26  ;;  %v71_v34 = vsel %vm70_vm1, %v68_v27, %v65_v31 }
  0x48   :  { %v73_v35 = vadd.f32 %v71_v34, %v45_v30 }
  0x49   :  { %v74_v36 = vmul.f32 1.442695, %v72_v33 }
  0x4a   :  { %v76_v37 = vmul.f32 1.442695, %v73_v35 }
  0x4b   :  { %115 = vpow2.f32 %v74_v36 }
  0x4c   :  { %117 = vpow2.f32 %v76_v37 }
  0x55   :  { %v116_v38 = vpop.eup %115 }
  0x56   :  { %v118_v39 = vpop.eup %117  ;;  %v78_v40 = vsub.f32 1.0, %v116_v38 }
  0x57   :  { %v79_v41 = vsub.f32 1.0, %v118_v39 }
  0x58   :  { %v80_v42 = vmul.f32 %v78_v40, %v78_v40 }
  0x59   :  { %v81_v43 = vmul.f32 %v79_v41, %v79_v41 }
  0x5a   :  { %v82_v44 = vmul.f32 0.25, %v80_v42 }
  0x5b   :  { %v83_v45 = vmul.f32 0.25, %v81_v43 }
  0x5c   :  { %v84_v46 = vmul.f32 %v82_v44, %v72_v33 }
  0x5d   :  { %v85_v47 = vmul.f32 %v83_v45, %v73_v35 }
  0x5e   :  { %86 = vst [vmem:[#allocation7] sm:$0xff] %v84_v46 }
  0x5f   :  { %87 = vst [vmem:[#allocation7 + $0x8] sm:$0xff] %v85_v47 }
  0x60   :  { %174 = shalt.err (!%p171_p6)
}
  0x61   :  { %s175_s8 = scalar_lea.hbm %s247_s2, 256 }
  0x62   :  { %p176_p7 = scmp.ne.s32.totalorder %s247_s2, %s175_s8  ;;  %p179_p8 = scmp.lt.u32.totalorder %s175_s8, %s247_s2 }
  0x64   :  { %p181_p9 = pnand %p179_p8, %p176_p7 }
  0x66   :  { %184 = shalt.err (!%p181_p9)
}
  0x67   :  { %97 = dma.vmem_to_hbm [thread:$0]  %s95_s4, 256, %s247_s2, [#allocation4]  }
  0x68   :  { %189 = dma.done.wait [#allocation4], 256  }
  0x69   :  { %190 = vsyncadd [#allocation4], 4294967040 }
  0x6a   :  { %101 = vsyncpa [#allocation3], 1 }
  0x6b   :  { %102 = vsyncpa [#allocation6], 1 }
  0x6c   :  { %103 = vsyncpa [#allocation4], 1 }

</bundles_post_ra>
